<compile_context>
chip_gen: v5e
topology: v5e:2x2
jax: 0.10.0
libtpu: 0.0.40
codegen_flags: <defaults>
</compile_context>

<pallas_src>
import jax
import jax.numpy as jnp
from jax import lax
from jax.experimental import pallas as pl
from jax.experimental.pallas import tpu as pltpu


def _round_up(x: int, m: int) -> int:
    return ((x + m - 1) // m) * m


def _gather_kernel(ids_ref, table_hbm, out_ref, row_buf, sem):
    # ids_ref:   (N_pad,) int32 in SMEM (scalar prefetch)
    # table_hbm: (V, D)   in HBM (memory_space=pl.ANY) -- manual DMA source
    # out_ref:   (TB, D)  VMEM output block for this grid step
    # row_buf:   (TB, D)  VMEM scratch the gathered rows are DMA'd into
    # sem:       single DMA semaphore shared by all row copies of this step
    tb = out_ref.shape[0]
    base = pl.program_id(0) * tb

    def issue(t, carry):
        row = ids_ref[base + t]
        pltpu.make_async_copy(table_hbm.at[row], row_buf.at[t], sem).start()
        return carry

    lax.fori_loop(0, tb, issue, 0)

    # All TB row copies target `sem`; DMA semaphores count bytes, so a single
    # wait sized like the full (TB, D) buffer drains every copy of this step
    # (one scalar wait instead of TB of them).
    pltpu.make_async_copy(row_buf, row_buf, sem).wait()

    out_ref[...] = row_buf[...]


def token_embedding(input_ids: jax.Array, table: jax.Array,
                    *, block_tokens: int = 512) -> jax.Array:
    """input_ids: [B, S] int, table: [V, D] float -> [B, S, D] float."""
    b, s = input_ids.shape
    v, d = table.shape
    n = b * s

    ids = input_ids.reshape(n).astype(jnp.int32)
    # Guard against DMA-level OOB (nn.Embedding would error on invalid ids).
    ids = jnp.clip(ids, 0, v - 1)

    # Token-block size: multiple of 8 (sublane), capped at block_tokens.
    # VMEM per step: row_buf (TB*D) + double-buffered out block (2*TB*D)
    # -> 3*TB*D*itemsize; TB=512, D=256, f32 => 1.5 MiB, well under limits.
    tb = min(block_tokens, _round_up(n, 8))
    n_pad = _round_up(n, tb)
    if n_pad != n:
        # Padded slots fetch row 0 (the zeroed padding row) and are sliced off.
        ids = jnp.pad(ids, (0, n_pad - n))

    grid = (n_pad // tb,)

    out = pl.pallas_call(
        _gather_kernel,
        out_shape=jax.ShapeDtypeStruct((n_pad, d), table.dtype),
        grid_spec=pltpu.PrefetchScalarGridSpec(
            num_scalar_prefetch=1,                         # ids -> SMEM
            grid=grid,
            in_specs=[pl.BlockSpec(memory_space=pl.ANY)],  # table stays in HBM
            out_specs=pl.BlockSpec((tb, d), lambda i, ids: (i, 0)),
            scratch_shapes=[
                pltpu.VMEM((tb, d), table.dtype),          # gathered-row buffer
                pltpu.SemaphoreType.DMA,                   # shared DMA semaphore
            ],
        ),
        compiler_params=pltpu.CompilerParams(
            dimension_semantics=("parallel",),             # token blocks independent
        ),
    )(ids, table)

    return out[:n].reshape(b, s, d)


def init_token_embedding(key, vocab_size: int, embedding_dim: int,
                         padding_idx: int = 0) -> jax.Array:
    """Synthetic init matching nn.Embedding(vocab, dim, padding_idx): padding row = 0."""
    # TODO(synk): the module's custom init_weights body is not in the spec; using
    # a normal init with the padding row zeroed (forward semantics are identical).
    table = jax.random.normal(key, (vocab_size, embedding_dim), jnp.float32)
    table = table.at[padding_idx].set(0.0)
    return table


if __name__ == "__main__":
    vocab_size = 64
    embedding_dim = 128
    padding_idx = 0
    batch, seq = 2, 8

    key = jax.random.PRNGKey(0)
    k_table, k_ids = jax.random.split(key)

    table = init_token_embedding(k_table, vocab_size, embedding_dim, padding_idx)
    input_ids = jax.random.randint(k_ids, (batch, seq), 0, vocab_size, jnp.int32)
    # Force a couple of padding tokens to exercise the zeroed padding row.
    input_ids = input_ids.at[0, 0].set(padding_idx).at[1, -1].set(padding_idx)

    out = token_embedding(input_ids, table)
    out = jax.block_until_ready(out)

    # Reference check: plain JAX gather.
    ref = table[input_ids]
    assert out.shape == (batch, seq, embedding_dim)
    assert jnp.allclose(out, ref, atol=1e-6), "mismatch vs reference gather"
    assert jnp.allclose(out[0, 0], 0.0), "padding row must be zeros"

    print("KERNEL_OK")
</pallas_src>

<mosaic_0001>
module attributes {stable_mosaic.version = 11 : i64} {
  func.func @_gather_kernel(%arg0: i32, %arg1: memref<16xi32, #tpu.memory_space<smem>>, %arg2: memref<64x128xf32, #tpu.memory_space<any>>, %arg3: memref<16x128xf32, #tpu.memory_space<vmem>>, %arg4: memref<16x128xf32, #tpu.memory_space<vmem>>, %arg5: memref<!tpu.dma_semaphore, #tpu.memory_space<semaphore_mem>>) attributes {dimension_semantics = [#tpu.dimension_semantics<parallel>], iteration_bounds = array<i64: 1>, scalar_prefetch = 1 : i64, scratch_operands = 2 : i64, tpu.core_type = #tpu.core_type<tc>, window_params = [{}, {transform_indices = @transform_1, window_bounds = array<i64: 16, 128>}]} {
    %c16_i32 = arith.constant 16 : i32
    %0 = arith.muli %arg0, %c16_i32 : i32
    %c0_i32 = arith.constant 0 : i32
    %c16_i32_0 = arith.constant 16 : i32
    %1 = arith.addi %c0_i32, %c16_i32_0 : i32
    %c1_i32 = arith.constant 1 : i32
    scf.for %arg6 = %c0_i32 to %1 step %c1_i32  : i32 {
      %4 = arith.addi %0, %arg6 : i32
      %5 = arith.index_cast %4 : i32 to index
      %6 = memref.load %arg1[%5] : memref<16xi32, #tpu.memory_space<smem>>
      %c0_i32_5 = arith.constant 0 : i32
      %7 = tpu.memref_slice %arg2[%6, %c0_i32_5] : memref<64x128xf32, #tpu.memory_space<any>> -> memref<1x128xf32, #tpu.memory_space<any>>
      %8 = tpu.memref_squeeze %7 : memref<1x128xf32, #tpu.memory_space<any>> -> memref<128xf32, #tpu.memory_space<any>>
      %c0_i32_6 = arith.constant 0 : i32
      %9 = tpu.memref_slice %arg4[%arg6, %c0_i32_6] : memref<16x128xf32, #tpu.memory_space<vmem>> -> memref<1x128xf32, #tpu.memory_space<vmem>>
      %10 = tpu.memref_squeeze %9 : memref<1x128xf32, #tpu.memory_space<vmem>> -> memref<128xf32, #tpu.memory_space<vmem>>
      tpu.enqueue_dma source(%8 : memref<128xf32, #tpu.memory_space<any>>) target(%10 : memref<128xf32, #tpu.memory_space<vmem>>) target_semaphore(%arg5 : memref<!tpu.dma_semaphore, #tpu.memory_space<semaphore_mem>>)
    }
    %c16_i32_1 = arith.constant 16 : i32
    tpu.wait_dma2 semaphore(%arg5 : memref<!tpu.dma_semaphore, #tpu.memory_space<semaphore_mem>>) src(%arg4 : memref<16x128xf32, #tpu.memory_space<vmem>>) dst(%arg4 : memref<16x128xf32, #tpu.memory_space<vmem>>)
    %c0 = arith.constant 0 : index
    %c0_2 = arith.constant 0 : index
    %2 = vector.load %arg4[%c0, %c0_2] : memref<16x128xf32, #tpu.memory_space<vmem>>, vector<16x128xf32>
    %c0_3 = arith.constant 0 : index
    %c0_4 = arith.constant 0 : index
    %3 = vector.load %arg3[%c0_3, %c0_4] : memref<16x128xf32, #tpu.memory_space<vmem>>, vector<16x128xf32>
    tpu.vector_store %arg3[%c0_3, %c0_4], %2 {strides = array<i32>} : memref<16x128xf32, #tpu.memory_space<vmem>>, vector<16x128xf32>,
    return
  }
  func.func @transform_1(%arg0: i32, %arg1: memref<16xi32, #tpu.memory_space<smem>>) -> (i32, i32) {
    %c0_i32 = arith.constant 0 : i32
    %c0_i32_0 = arith.constant 0 : i32
    return %arg0, %c0_i32 : i32, i32
  }
}

</mosaic_0001>

<bundles_post_ra>
// kernel: tpu_custom_call.1
= control target key start
LH: loop header
LB: loop body
LE: loop exit
PB: predicated region body
PF: predicated region fallthrough
CT: control target
= control target key end

     0   :  { %s165_s12 = smov [#allocation5]   ;;  %s210_s0 = inlined_call_operand.hbm [shape: s32[16], index: 0, kind: input, shape index: {}]   ;;  %s211_s1 = inlined_call_operand.hbm [shape: f32[64,128], index: 1, kind: input, shape index: {}]   ;;  %s212_s2 = inlined_call_operand.hbm [shape: f32[16,128], index: 2, kind: output, shape index: {}]  }
   0x1   :  { %s8_s11 = sshll.u32 %s210_s0, 4  ;;  %s9_s11 = int_to_ptr.hbm [resolvable:$true] %s8_s11 }
   0x2   :  { %11 = dma.hbm_to_smem %s9_s11, 16, %s165_s12, [#allocation4] }
   0x3   :  { %155 = dma.done.wait [#allocation4], 16 }
   0x4   :  { %156 = vsyncadd [#allocation4], 4294967280 }
   0x5   :  { %14 = sfence }
   0x6   :  { %15 = vsyncpa [#allocation7], 0  ;;  %s188_s13 = smov 0  }
   0x7 LB: > { %s24_s14 = sld [smem:[#allocation5 + %s163_s13]]  ;;  %s26_s15 = scalar_lea.vmem [#allocation2], %s163_s13  ;;  %s163_s13 = sphi %s188_s13, %s22_s13  }
   0x8   : > { %s36_s16 = sshll.u32 %s26_s15, 4  ;;  %s107_s24 = scalar_lea.hbm %s211_s1, 64  ;;  %s37_s16 = int_to_ptr.vmem [resolvable:$true] %s36_s16 }
   0xd   : > { %s25_s18 = scalar_lea.hbm %s211_s1, %s24_s14 }
   0xe   : > { %s34_s19 = sshll.u32 %s25_s18, 4  ;;  %s35_s19 = int_to_ptr.hbm [resolvable:$true] %s34_s19 }
   0xf   : > { %s103_s20 = sshra.s32 %s35_s19, 4  ;;  %s104_s20 = int_to_ptr.hbm [resolvable:$true] %s103_s20 }
  0x10   : > { %s105_s21 = scalar_lea.hbm %s104_s20, 1  ;;  %p108_p1 = scmp.lt.s32.totalorder %s104_s20, %s211_s1 }
  0x11   : > { %p106_p0 = scmp.ne.s32.totalorder %s104_s20, %s105_s21  ;;  %p109_p2 = scmp.lt.s32.totalorder %s107_s24, %s105_s21 }
  0x13   : > { %p110_p3 = por %p109_p2, %p108_p1 }
  0x15   : > { %p111_p4 = pnand %p110_p3, %p106_p0 }
  0x17   : > { %114 = shalt.err (!%p111_p4)  }
  0x18   : > { %s115_s27 = sshra.s32 %s37_s16, 4  ;;  %s166_s29 = smov [#allocation2]   ;;  %s116_s27 = int_to_ptr.vmem [resolvable:$true] %s115_s27 }
  0x19   : > { %s117_s28 = scalar_lea.vmem %s116_s27, 1  ;;  %s119_s30 = scalar_lea.vmem %s166_s29, 16 }
  0x1a   : > { %p118_p5 = scmp.ne.s32.totalorder %s116_s27, %s117_s28  ;;  %p120_p6 = scmp.lt.s32.totalorder %s116_s27, [#allocation2] }
  0x1b   : > { %p121_p7 = scmp.lt.s32.totalorder %s119_s30, %s117_s28 }
  0x1d   : > { %p122_p8 = por %p121_p7, %p120_p6 }
  0x1f   : > { %p123_p9 = pnand %p122_p8, %p118_p5 }
  0x21   : > { %126 = shalt.err (!%p123_p9)  }
  0x22   : > { %39 = dma.hbm_to_vmem [thread:$0]  %s35_s19, 16, %s37_s16, [#allocation3] }
  0x23   : > { %s22_s13 = sadd.s32 1, %s163_s13  }
  0x24   : > { %p19_p10 = scmp.ge.s32.totalorder %s22_s13, 16  }
  0x26   :  { %21 = sbr.rel (!%p19_p10) target bundleno = 7 (0x7), region = 33 }
  0x2b   :  { %157 = dma.done.wait [#allocation3], 256 }
  0x2c   :  { %158 = vsyncadd [#allocation3], 4294967040  ;;  %s167_s3 = smov [#allocation6]   ;;  %s53_s7 = sshll.u32 %s212_s2, 4  ;;  %v43_v0 = vld [vmem:[#allocation2] sm:$0xff]  ;;  %v44_v1 = vld [vmem:[#allocation2 + $0x8] sm:$0xff]  ;;  %s54_s7 = int_to_ptr.hbm [resolvable:$true] %s53_s7 }
  0x2d   :  { %s51_s4 = sshll.u32 %s167_s3, 4  ;;  %45 = vst [vmem:[#allocation6] sm:$0xff] %v43_v0  ;;  %s168_s8 = smov 128   ;;  %s52_s4 = int_to_ptr.vmem [resolvable:$true] %s51_s4 }
  0x2e   :  { %46 = vst [vmem:[#allocation6 + $0x8] sm:$0xff] %v44_v1  ;;  %s169_s9 = smov 8  }
  0x2f   :  { %59 = dma.vmem_to_hbm [thread:$0]  %s52_s4, 256, %s54_s7, [#allocation7], %s168_s8, %s168_s8, %s169_s9  }
  0x30   :  { %159 = dma.done.wait [#allocation7], 256  }
  0x31   :  { %160 = vsyncadd [#allocation7], 4294967040 }
  0x32   :  { %64 = vsyncpa [#allocation7], 1 }
  0x33   :  { %65 = vsyncmov [#allocation3] }
  0x36   :  { %s66_s1 = vpop.sfrf %65 }
  0x37   :  { %p78_p11 = scmp.ne.s32.totalorder %s66_s1, 0 }
  0x39   :  { %70 = shalt.err (%p78_p11)  }

</bundles_post_ra>
